<compile_context>
chip_gen: v7x
topology: tpu7x:2x2x1
jax: 0.10.0
libtpu: 0.0.40
codegen_flags: <defaults>
</compile_context>

<pallas_src>
import functools

import jax
import jax.numpy as jnp
from jax.experimental import pallas as pl
from jax.experimental.pallas import tpu as pltpu


def _cb_focal_kernel(e_ref, x_ref, lab_ref, a_ref, out_ref, *,
                     gamma, epsilon, n_classes, r_pack, n_rows, tile_g,
                     part_rows):
    i = pl.program_id(0)
    W = x_ref.shape[1]

    x = x_ref[...].astype(jnp.float32)                      # (tile_g, W)

    if r_pack > 1:
        # Expand per-row labels / alpha across each group of C lanes with the
        # constant 0/1 matrix E (one nonzero per column -> exact).
        e = e_ref[...]                                      # (R, W) bf16
        lab_exp = jnp.dot(lab_ref[...], e,                  # labels exact in bf16
                          preferred_element_type=jnp.float32)
        a = a_ref[...]                                      # (tile_g, R) f32
        a_hi = a.astype(jnp.bfloat16)
        a_lo = (a - a_hi.astype(jnp.float32)).astype(jnp.bfloat16)
        a_exp = (jnp.dot(a_hi, e, preferred_element_type=jnp.float32)
                 + jnp.dot(a_lo, e, preferred_element_type=jnp.float32))
    else:
        lab_exp = lab_ref[...].astype(jnp.float32)          # (tile_g, 1) broadcast
        a_exp = a_ref[...]                                  # (tile_g, 1) broadcast

    # one-hot mask: lane j of a packed row belongs to class j % C
    class_id = jax.lax.broadcasted_iota(jnp.int32, (tile_g, W), 1) % n_classes
    hot = lab_exp == class_id.astype(jnp.float32)

    eps_c = epsilon / n_classes
    y = jnp.where(hot, 1.0 - epsilon + eps_c, eps_c)

    relu = jnp.maximum(x, 0.0)
    sp = relu + jnp.log1p(jnp.exp(x - 2.0 * relu))          # softplus(x), stable
    xy = x * y
    bce = sp - xy                                           # stable BCE-with-logits
    if gamma == 0.0:
        elem = bce
    else:
        elem = jnp.exp((xy + sp - x) * (-gamma)) * bce      # focal modulator * bce

    # mask packed rows beyond the true extent (last partial block: undefined data)
    rows = i * tile_g + jax.lax.broadcasted_iota(jnp.int32, (tile_g, 1), 0)
    weighted = jnp.where(rows < n_rows, a_exp * elem, 0.0)

    # per-tile lane-dense partial sums (pure VPU vreg adds, no XLU reduce)
    if tile_g == part_rows:
        out_ref[...] = weighted
    else:
        out_ref[...] = jnp.sum(
            weighted.reshape(tile_g // part_rows, part_rows, W), axis=0)


def cb_loss(logits, labels, *, beta=0.9999, gamma=2.0, epsilon=0.1):
    """Class-balanced focal loss (CB_loss.forward, loss_type='focal')."""
    B, C = logits.shape
    labels = labels.astype(jnp.int32)

    # ---- class-balanced weights from this batch's per-class counts (as in PyTorch)
    counts = jnp.zeros((C,), jnp.float32).at[labels].add(1.0)
    effective_num = 1.0 - jnp.power(jnp.float32(beta), counts)
    w = (1.0 - beta) / (effective_num + 1e-8)
    w = w / jnp.sum(w) * C

    # per-row alpha hoisted to the wrapper (tiny [B] gather):
    #   alpha_b = sum_c w[c]*y[b,c] = (1-eps)*w[label_b] + eps   (uses sum(w) = C)
    alpha = ((1.0 - epsilon) * w[labels] + epsilon).astype(jnp.float32)

    # ---- lane-dense packing: [B, C] -> [G, W],  W = R*C,  R | B,  R <= 128//C
    r_pack = 1
    for cand in range(min(B, max(1, 128 // C)), 0, -1):
        if B % cand == 0:
            r_pack = cand
            break
    G = B // r_pack
    W = r_pack * C

    x_packed = logits.reshape(G, W)                          # free (row-major)
    if r_pack > 1:
        lab_dtype = jnp.bfloat16                             # labels < C <= 64: exact
        e_mat = jnp.repeat(jnp.eye(r_pack, dtype=jnp.bfloat16), C, axis=1)  # (R, W)
    else:
        lab_dtype = jnp.float32
        e_mat = jnp.zeros((1, 1), jnp.bfloat16)              # unused dummy
    lab_packed = labels.astype(lab_dtype).reshape(G, r_pack)
    a_packed = alpha.reshape(G, r_pack)

    # ---- tile size from the VMEM budget (lane-padded bytes, double-buffered)
    lane_pad = lambda n: ((n + 127) // 128) * 128
    row_bytes = (logits.dtype.itemsize * lane_pad(W)
                 + lab_packed.dtype.itemsize * lane_pad(r_pack)
                 + 4 * lane_pad(r_pack))
    tile_g = (4 * 1024 * 1024) // max(row_bytes, 1)          # ~4 MiB per stage
    tile_g = max(8, min(2048, (tile_g // 8) * 8))
    if G <= 8:
        tile_g = G
    else:
        tile_g = min(tile_g, (G // 8) * 8)
    part_rows = 8 if tile_g % 8 == 0 else tile_g
    num_tiles = -(-G // tile_g)

    vmem_limit = int(2.5 * tile_g * row_bytes) + (4 << 20)
    vmem_limit = max(16 << 20, min(vmem_limit, 48 << 20))    # v7x-safe (<64 MiB)

    kernel = functools.partial(
        _cb_focal_kernel,
        gamma=float(gamma), epsilon=float(epsilon), n_classes=C,
        r_pack=r_pack, n_rows=G, tile_g=tile_g, part_rows=part_rows)

    partials = pl.pallas_call(
        kernel,
        out_shape=jax.ShapeDtypeStruct((num_tiles, part_rows, W), jnp.float32),
        grid_spec=pltpu.PrefetchScalarGridSpec(
            num_scalar_prefetch=0,
            grid=(num_tiles,),
            in_specs=[
                pl.BlockSpec(e_mat.shape, lambda i: (0, 0)),        # expansion matrix
                pl.BlockSpec((tile_g, W), lambda i: (i, 0)),        # packed logits
                pl.BlockSpec((tile_g, r_pack), lambda i: (i, 0)),   # packed labels
                pl.BlockSpec((tile_g, r_pack), lambda i: (i, 0)),   # packed alpha
            ],
            out_specs=pl.BlockSpec((None, part_rows, W), lambda i: (i, 0, 0)),
        ),
        compiler_params=pltpu.CompilerParams(
            dimension_semantics=("parallel",),                      # dual-TC on v7x
            vmem_limit_bytes=vmem_limit,
        ),
    )(e_mat, x_packed, lab_packed, a_packed)

    # denominator sum(labels_one_hot) == B (each smoothed row sums to 1)
    return jnp.sum(partials) / B


def _cb_loss_ref(logits, labels, *, beta=0.9999, gamma=2.0, epsilon=0.1):
    """Pure-JAX reference mirroring the PyTorch forward (focal path)."""
    B, C = logits.shape
    one_hot = jax.nn.one_hot(labels, C, dtype=jnp.float32)
    samples_per_cls = jnp.sum(one_hot, axis=0)
    effective_num = 1.0 - jnp.power(jnp.float32(beta), samples_per_cls)
    w = (1.0 - beta) / (effective_num + 1e-8)
    w = w / jnp.sum(w) * C
    y = (1.0 - epsilon) * one_hot + epsilon / C
    alpha = jnp.sum(w[None, :] * y, axis=1, keepdims=True)
    x = logits.astype(jnp.float32)
    bce = jnp.maximum(x, 0.0) - x * y + jnp.log1p(jnp.exp(-jnp.abs(x)))
    modulator = jnp.exp(-gamma * y * x - gamma * jnp.log1p(jnp.exp(-x)))
    loss = alpha * modulator * bce
    return jnp.sum(loss) / jnp.sum(y)


if __name__ == "__main__":
    key = jax.random.PRNGKey(0)
    B, C = 320, 4  # [batch, no_of_classes] logits; exercises packing + partial block
    k1, k2 = jax.random.split(key)
    logits = jax.random.normal(k1, (B, C), dtype=jnp.float32)
    labels = jax.random.randint(k2, (B,), 0, C, dtype=jnp.int32)

    loss = cb_loss(logits, labels, beta=0.9999, gamma=2.0, epsilon=0.1)
    jax.block_until_ready(loss)

    ref = _cb_loss_ref(logits, labels, beta=0.9999, gamma=2.0, epsilon=0.1)
    assert jnp.allclose(loss, ref, rtol=5e-4, atol=1e-6), (loss, ref)

    print("KERNEL_OK")
</pallas_src>

<mosaic_0001>
module attributes {stable_mosaic.version = 11 : i64} {
  func.func @_cb_focal_kernel(%arg0: i32, %arg1: memref<32x128xbf16, #tpu.memory_space<vmem>>, %arg2: memref<8x128xf32, #tpu.memory_space<vmem>>, %arg3: memref<8x32xbf16, #tpu.memory_space<vmem>>, %arg4: memref<8x32xf32, #tpu.memory_space<vmem>>, %arg5: memref<1x8x128xf32, #tpu.memory_space<vmem>>) attributes {dimension_semantics = [#tpu.dimension_semantics<parallel>], iteration_bounds = array<i64: 2>, scalar_prefetch = 0 : i64, scratch_operands = 0 : i64, tpu.core_type = #tpu.core_type<tc>, window_params = [{pipeline_mode = #tpu.pipeline_mode<synchronous>, transform_indices = @transform_0, window_bounds = array<i64: 32, 128>}, {transform_indices = @transform_1, window_bounds = array<i64: 8, 128>}, {transform_indices = @transform_2, window_bounds = array<i64: 8, 32>}, {transform_indices = @transform_3, window_bounds = array<i64: 8, 32>}, {transform_indices = @transform_4, window_bounds = array<i64: 1, 8, 128>}]} {
    %c0 = arith.constant 0 : index
    %c0_0 = arith.constant 0 : index
    %0 = vector.load %arg2[%c0, %c0_0] : memref<8x128xf32, #tpu.memory_space<vmem>>, vector<8x128xf32>
    %c0_1 = arith.constant 0 : index
    %c0_2 = arith.constant 0 : index
    %1 = vector.load %arg1[%c0_1, %c0_2] : memref<32x128xbf16, #tpu.memory_space<vmem>>, vector<32x128xbf16>
    %c0_3 = arith.constant 0 : index
    %c0_4 = arith.constant 0 : index
    %2 = vector.load %arg3[%c0_3, %c0_4] : memref<8x32xbf16, #tpu.memory_space<vmem>>, vector<8x32xbf16>
    %cst = arith.constant dense<0.000000e+00> : vector<8x128xf32>
    %3 = tpu.matmul %2, %1, %cst {dimension_numbers = #tpu.dot_dimension_numbers<[1], [0], [0], [1], [0, 0, 1, 1], [], []>} : vector<8x32xbf16>, vector<32x128xbf16>, vector<8x128xf32> -> vector<8x128xf32>
    %c0_5 = arith.constant 0 : index
    %c0_6 = arith.constant 0 : index
    %4 = vector.load %arg4[%c0_5, %c0_6] : memref<8x32xf32, #tpu.memory_space<vmem>>, vector<8x32xf32>
    %5 = arith.truncf %4 : vector<8x32xf32> to vector<8x32xbf16>
    %6 = arith.extf %5 : vector<8x32xbf16> to vector<8x32xf32>
    %7 = arith.subf %4, %6 : vector<8x32xf32>
    %8 = arith.truncf %7 : vector<8x32xf32> to vector<8x32xbf16>
    %cst_7 = arith.constant dense<0.000000e+00> : vector<8x128xf32>
    %9 = tpu.matmul %5, %1, %cst_7 {dimension_numbers = #tpu.dot_dimension_numbers<[1], [0], [0], [1], [0, 0, 1, 1], [], []>} : vector<8x32xbf16>, vector<32x128xbf16>, vector<8x128xf32> -> vector<8x128xf32>
    %cst_8 = arith.constant dense<0.000000e+00> : vector<8x128xf32>
    %10 = tpu.matmul %8, %1, %cst_8 {dimension_numbers = #tpu.dot_dimension_numbers<[1], [0], [0], [1], [0, 0, 1, 1], [], []>} : vector<8x32xbf16>, vector<32x128xbf16>, vector<8x128xf32> -> vector<8x128xf32>
    %11 = arith.addf %9, %10 : vector<8x128xf32>
    %12 = tpu.iota {dimensions = array<i32: 1>} : vector<8x128xi32>
    %c4_i32 = arith.constant 4 : i32
    %c0_i32 = arith.constant 0 : i32
    %13 = arith.cmpi eq, %c4_i32, %c0_i32 : i32
    %c1_i32 = arith.constant 1 : i32
    %14 = arith.select %13, %c1_i32, %c4_i32 : i32
    %15 = vector.broadcast %14 : i32 to vector<8x128xi32>
    %16 = arith.remsi %12, %15 : vector<8x128xi32>
    %c0_i32_9 = arith.constant 0 : i32
    %17 = vector.broadcast %c0_i32_9 : i32 to vector<8x128xi32>
    %18 = arith.cmpi ne, %16, %17 : vector<8x128xi32>
    %c0_i32_10 = arith.constant 0 : i32
    %19 = vector.broadcast %c0_i32_10 : i32 to vector<8x128xi32>
    %20 = arith.cmpi slt, %16, %19 : vector<8x128xi32>
    %c0_i32_11 = arith.constant 0 : i32
    %21 = arith.cmpi slt, %14, %c0_i32_11 : i32
    %22 = vector.broadcast %21 : i1 to vector<8x128xi1>
    %23 = vector.broadcast %22 : vector<8x128xi1> to vector<8x128xi1>
    %24 = arith.xori %20, %23 : vector<8x128xi1>
    %25 = arith.andi %24, %18 : vector<8x128xi1>
    %26 = vector.broadcast %14 : i32 to vector<8x128xi32>
    %27 = arith.addi %16, %26 : vector<8x128xi32>
    %28 = arith.select %25, %27, %16 : vector<8x128xi1>, vector<8x128xi32>
    %29 = arith.sitofp %28 : vector<8x128xi32> to vector<8x128xf32>
    %30 = arith.cmpf oeq, %3, %29 : vector<8x128xf32>
    %cst_12 = arith.constant 9.250000e-01 : f32
    %cst_13 = arith.constant 2.500000e-02 : f32
    %31 = vector.broadcast %cst_12 : f32 to vector<8x128xf32>
    %32 = vector.broadcast %cst_13 : f32 to vector<8x128xf32>
    %33 = arith.select %30, %31, %32 : vector<8x128xi1>, vector<8x128xf32>
    %cst_14 = arith.constant 0.000000e+00 : f32
    %34 = vector.broadcast %cst_14 : f32 to vector<8x128xf32>
    %35 = arith.maximumf %0, %34 : vector<8x128xf32>
    %cst_15 = arith.constant 2.000000e+00 : f32
    %36 = vector.broadcast %cst_15 : f32 to vector<8x128xf32>
    %37 = arith.mulf %36, %35 : vector<8x128xf32>
    %38 = arith.subf %0, %37 : vector<8x128xf32>
    %39 = math.exp %38 : vector<8x128xf32>
    %40 = math.log1p %39 : vector<8x128xf32>
    %41 = arith.addf %35, %40 : vector<8x128xf32>
    %42 = arith.mulf %0, %33 : vector<8x128xf32>
    %43 = arith.subf %41, %42 : vector<8x128xf32>
    %44 = arith.addf %42, %41 : vector<8x128xf32>
    %45 = arith.subf %44, %0 : vector<8x128xf32>
    %cst_16 = arith.constant -2.000000e+00 : f32
    %46 = vector.broadcast %cst_16 : f32 to vector<8x128xf32>
    %47 = arith.mulf %45, %46 : vector<8x128xf32>
    %48 = math.exp %47 : vector<8x128xf32>
    %49 = arith.mulf %48, %43 : vector<8x128xf32>
    %c8_i32 = arith.constant 8 : i32
    %50 = arith.muli %arg0, %c8_i32 : i32
    %51 = tpu.iota {dimensions = array<i32: 0>} : vector<8x1xi32>
    %52 = vector.broadcast %50 : i32 to vector<8x1xi32>
    %53 = arith.addi %52, %51 : vector<8x1xi32>
    %c10_i32 = arith.constant 10 : i32
    %54 = vector.broadcast %c10_i32 : i32 to vector<8x1xi32>
    %55 = arith.cmpi slt, %53, %54 : vector<8x1xi32>
    %56 = arith.mulf %11, %49 : vector<8x128xf32>
    %cst_17 = arith.constant 0.000000e+00 : f32
    %57 = vector.shape_cast %55 : vector<8x1xi1> to vector<8x1xi1>
    %58 = vector.broadcast %57 : vector<8x1xi1> to vector<8x128xi1>
    %59 = vector.broadcast %cst_17 : f32 to vector<8x128xf32>
    %60 = arith.select %58, %56, %59 : vector<8x128xi1>, vector<8x128xf32>
    %c0_18 = arith.constant 0 : index
    %c0_19 = arith.constant 0 : index
    %c0_20 = arith.constant 0 : index
    %61 = vector.load %arg5[%c0_18, %c0_19, %c0_20] : memref<1x8x128xf32, #tpu.memory_space<vmem>>, vector<1x8x128xf32>
    %62 = vector.shape_cast %61 : vector<1x8x128xf32> to vector<8x128xf32>
    %63 = vector.shape_cast %60 : vector<8x128xf32> to vector<1x8x128xf32>
    tpu.vector_store %arg5[%c0_18, %c0_19, %c0_20], %63 {strides = array<i32>} : memref<1x8x128xf32, #tpu.memory_space<vmem>>, vector<1x8x128xf32>,
    return
  }
  func.func @transform_0(%arg0: i32) -> (i32, i32) {
    %c0_i32 = arith.constant 0 : i32
    %c0_i32_0 = arith.constant 0 : i32
    %c0_i32_1 = arith.constant 0 : i32
    return %c0_i32, %c0_i32_0 : i32, i32
  }
  func.func @transform_1(%arg0: i32) -> (i32, i32) {
    %c0_i32 = arith.constant 0 : i32
    %c0_i32_0 = arith.constant 0 : i32
    return %arg0, %c0_i32 : i32, i32
  }
  func.func @transform_2(%arg0: i32) -> (i32, i32) {
    %c0_i32 = arith.constant 0 : i32
    %c0_i32_0 = arith.constant 0 : i32
    return %arg0, %c0_i32 : i32, i32
  }
  func.func @transform_3(%arg0: i32) -> (i32, i32) {
    %c0_i32 = arith.constant 0 : i32
    %c0_i32_0 = arith.constant 0 : i32
    return %arg0, %c0_i32 : i32, i32
  }
  func.func @transform_4(%arg0: i32) -> (i32, i32, i32) {
    %c0_i32 = arith.constant 0 : i32
    %c0_i32_0 = arith.constant 0 : i32
    %c0_i32_1 = arith.constant 0 : i32
    return %arg0, %c0_i32, %c0_i32_0 : i32, i32, i32
  }
}

</mosaic_0001>

<bundles_post_ra>
// kernel: tpu_custom_call.1
= control target key start
LH: loop header
LB: loop body
LE: loop exit
PB: predicated region body
PF: predicated region fallthrough
CT: control target
= control target key end

     0   :  { %s1303_s0 = inlined_call_operand.hbm [shape: bf16[32,128], index: 0, kind: input, shape index: {}]   ;;  %s1304_s1 = inlined_call_operand.hbm [shape: f32[10,128], index: 1, kind: input, shape index: {}]   ;;  %s1305_s2 = inlined_call_operand.hbm [shape: bf16[10,32], index: 2, kind: input, shape index: {}]   ;;  %s1306_s3 = inlined_call_operand.hbm [shape: f32[10,32], index: 3, kind: input, shape index: {}]   ;;  %s1307_s4 = inlined_call_operand.hbm [shape: f32[2,8,128], index: 4, kind: output, shape index: {}]  }
   0x1   :  { %1320 = sst [smem:[#allocation17_spill]] %s1304_s1 }
   0x2   :  { %9 = vsyncpa [#allocation3], 0 }
   0x3   :  { %10 = vsyncpa [#allocation6], 0 }
   0x4   :  { %12 = vsyncpa [#allocation6 + $0x1], 0 }
   0x5   :  { %13 = vsyncpa [#allocation9], 0 }
   0x6   :  { %15 = vsyncpa [#allocation9 + $0x1], 0 }
   0x7   :  { %16 = vsyncpa [#allocation4], 0 }
   0x8   :  { %18 = vsyncpa [#allocation4 + $0x1], 0  ;;  %s1015_s15 = smov 0   ;;  %s1017_s16 = smov 0  }
   0x9   :  { %s1019_s17 = smov 0   ;;  %s1021_s18 = smov 0  }
   0xa LB: > { %1321 = sst [smem:[#allocation15_spill]] %s974_s17  ;;  %s1036_s19 = sadd.s32 1, %s978_s18   ;;  %s978_s18 = sphi %s1021_s18, %s1348_s18   ;;  %s974_s17 = sphi %s1019_s17, %s1345_s17   ;;  %s970_s16 = sphi %s1017_s16, %s1347_s16   ;;  %s966_s15 = sphi %s1015_s15, %s1346_s15  }
   0xb   : > { %s52_s20 = sadd.s32 1, %s974_s17  ;;  %s49_s21 = ssub.s32 %s978_s18, %s1036_s19 }
   0xc   : > { %p1308_p0 = scmp.ne.s32.totalorder %s974_s17, %s970_s16  ;;  %p50_p1 = scmp.eq.s32.totalorder %s49_s21, 0 }
   0xd   : > { %p60_p2 = scmp.eq.s32.totalorder %s978_s18, 0  ;;  %p737_p4 = scmp.lt.s32.totalorder %s978_s18, 2 }
   0xe   : > { %s1047_s22 = scalar_select %p50_p1, %s974_s17, %s52_s20  }
   0xf   : > { %p61_p5 = por %p60_p2, %p1308_p0  ;;  %s180_s23 = sand.u32 1, %s978_s18  }
  0x10   : > { %1322 = sst [smem:[#allocation16_spill]] %s1047_s22  ;;  %s1054_s24 = sand.u32 1, %s974_s17  }
  0x11   : > { %s1309_s25 = sshll.u32 %s1054_s24, 3  ;;  %s1310_s26 = sshll.u32 %s978_s18, 7 }
  0x12   : > { %s1323_s1 = sld [smem:[#allocation17_spill]]  ;;  %s184_s30 = scalar_lea.vmem [#allocation5], %s1309_s25 }
  0x13   : > { %s191_s5 = sshll.u32 %s184_s30, 4  ;;  %p1067_p6 = pnand %p737_p4, %p61_p5  ;;  %s1071_s5 = int_to_ptr.vmem [resolvable:$true] %s191_s5 }
  0x14   : > { %s1073_s7 = scalar_lea.sflag [#allocation6], %s180_s23 }
  0x15   : > { %s1324_s6 = scalar_select %p1067_p6, 1, 0 }
  0x16   : > { %p1079_p8 = pneg %p1067_p6 }
  0x18   : > { %s1063_s29 = scalar_lea.hbm %s1323_s1, %s1310_s26  ;;  %s791_s12 = scalar_lea.hbm %s1323_s1, 256 }
  0x19   : > { %s786_s8 = scalar_lea.hbm %s1063_s29, 128  ;;  %p792_p11 = scmp.lt.u32.totalorder %s1063_s29, %s1323_s1 }
  0x1a   : > { %p787_p7 = scmp.ne.s32.totalorder %s1063_s29, %s786_s8  ;;  %p793_p12 = scmp.lt.u32.totalorder %s791_s12, %s786_s8 }
  0x1b   : > { %s1325_s9 = scalar_select %p1079_p8, 1, 0 }
  0x1c   : > { %p789_p9 = pnand %p1079_p8, %p787_p7  ;;  %p794_p13 = por %p793_p12, %p792_p11 }
  0x1d   : > { %p795_p1 = scmp.lt.u32.totalorder %s786_s8, %s1063_s29 }
  0x1e   : > { %p790_p10 = pneg %p789_p9 }
  0x1f   : > { %p796_p2 = por %p795_p1, %p794_p13 }
  0x21   : > { %p797_p4 = pnand %p796_p2, %p790_p10 }
  0x23   : > { %800 = shalt.err (!%p797_p4)
}
  0x24   : > { %s801_s20 = scalar_lea.vmem %s1071_s5, 128  ;;  %s980_s21 = smov [#allocation5]  }
  0x25   : > { %p802_p5 = scmp.ne.s32.totalorder %s1071_s5, %s801_s20  ;;  %s806_s23 = sshll.u32 %s980_s21, 4  ;;  %s807_s23 = int_to_ptr.vmem [resolvable:$false] %s806_s23 }
  0x26   : > { %s808_s27 = scalar_lea.vmem %s807_s23, 256  ;;  %p809_p3 = scmp.lt.s32.totalorder %s1071_s5, %s807_s23 }
  0x27   : > { %p804_p7 = pnand %p802_p5, %p1079_p8  ;;  %p810_p0 = scmp.lt.s32.totalorder %s808_s27, %s801_s20 }
  0x29   : > { %p805_p9 = pneg %p804_p7  ;;  %p811_p11 = por %p810_p0, %p809_p3 }
  0x2b   : > { %p812_p12 = pnand %p811_p11, %p805_p9 }
  0x2d   : > { %815 = shalt.err (!%p812_p12)
}
  0x2e   : > { %725 = dma.hbm_to_vmem [thread:$0]  (!%p1067_p6), %s1063_s29, 128, %s1071_s5, %s1073_s7  }
  0x2f   : > { %s1104_s28 = sadd.s32 4294967295, %s978_s18   ;;  %s643_s30 = sadd.s32 4294967294, %s978_s18  }
  0x30   : > { %p65_p0 = scmp.ne.s32.totalorder %s970_s16, %s966_s15  ;;  %p1312_p3 = scmp.eq.s32.totalorder %s1104_s28, 0 }
  0x31   : > { %p141_p10 = scmp.eq.s32.totalorder %s1104_s28, 1  ;;  %p147_p13 = scmp.eq.s32.totalorder %s643_s30, 1 }
  0x32   : > { %p1113_p1 = por %p1312_p3, %p65_p0  ;;  %p644_p2 = scmp.ge.s32.totalorder %s978_s18, 1 }
  0x33   : > { %p1327_p4 = scmp.ne.s32.totalorder %s974_s17, %s970_s16  ;;  %p1125_p7 = por %p147_p13, %p65_p0 }
  0x34   : > { %s1326_s8 = scalar_select %p1113_p1, 1, 0 }
  0x35   : > { %p1121_p5 = por %p141_p10, %p1327_p4  ;;  %p154_p9 = scmp.lt.s32.totalorder %s978_s18, 3 }
  0x36   : > { %s1329_s5 = scalar_select %p1125_p7, 1, 0 }
  0x37   : > { %s1328_s29 = scalar_select %p1121_p5, 1, 0 }
  0x38   : > { %p1130_p11 = pnand %p644_p2, %p154_p9  ;;  %s981_s11 = smov [#allocation2]  }
  0x39   : > { %s166_s12 = sshll.u32 %s981_s11, 4  ;;  %s649_s13 = sshll.u32 %s1054_s24, 2  ;;  %s1134_s12 = int_to_ptr.vmem [resolvable:$true] %s166_s12 }
  0x3a   : > { %s1330_s10 = scalar_select %p1130_p11, 1, 0 }
  0x3b   : > { %p718_p12 = pneg %p1130_p11  ;;  %s650_s14 = sshll.u32 %s978_s18, 6 }
  0x3c   : > { %s1149_s27 = scalar_lea.hbm %s1305_s2, %s650_s14  ;;  %s202_s30 = scalar_lea.vmem [#allocation7], %s649_s13 }
  0x3d   : > { %p1142_p10 = pnand %p718_p12, %p1312_p3  ;;  %s209_s25 = sshll.u32 %s202_s30, 4  ;;  %s1151_s25 = int_to_ptr.vmem [resolvable:$true] %s209_s25 }
  0x3e   : > { %s816_s1 = scalar_lea.hbm %s1303_s0, 256 }
  0x3f   : > { %p817_p0 = scmp.ne.s32.totalorder %s1303_s0, %s816_s1  ;;  %p818_p13 = pneg %p1142_p10 }
  0x40   : > { %p823_p9 = scmp.lt.u32.totalorder %s816_s1, %s1303_s0 }
  0x41   : > { %p819_p2 = pnand %p818_p13, %p817_p0 }
  0x43   : > { %p820_p4 = pneg %p819_p2 }
  0x45   : > { %p825_p12 = pnand %p823_p9, %p820_p4 }
  0x47   : > { %828 = shalt.err (!%p825_p12)
}
  0x48   : > { %s829_s13 = scalar_lea.vmem %s1134_s12, 256  ;;  %p837_p1 = scmp.lt.s32.totalorder %s1134_s12, %s1134_s12 }
  0x49   : > { %p830_p3 = scmp.ne.s32.totalorder %s1134_s12, %s829_s13  ;;  %p838_p11 = scmp.lt.s32.totalorder %s829_s13, %s829_s13 }
  0x4b   : > { %p832_p7 = pnand %p830_p3, %p818_p13  ;;  %p839_p6 = por %p838_p11, %p837_p1 }
  0x4d   : > { %p833_p5 = pneg %p832_p7 }
  0x4f   : > { %p840_p8 = pnand %p839_p6, %p833_p5 }
  0x51   : > { %843 = shalt.err (!%p840_p8)
}
  0x52   : > { %s982_s17 = smov 64   ;;  %s983_s1 = smov 4  }
  0x53   : > { %721 = dma.hbm_to_vmem [thread:$0]  (!%p1142_p10), %s1303_s0, 256, %s1134_s12, [#allocation3], %s982_s17, %s982_s17, %s983_s1  }
  0x54   : > { %s844_s14 = scalar_lea.hbm %s1149_s27, 64  ;;  %p1332_p7 = scmp.ne.s32.totalorder %s1325_s9, 0 }
  0x55   : > { %p845_p3 = scmp.ne.s32.totalorder %s1149_s27, %s844_s14  ;;  %s849_s21 = scalar_lea.hbm %s1305_s2, 128 }
  0x56   : > { %p850_p8 = scmp.lt.u32.totalorder %s1149_s27, %s1305_s2  ;;  %p851_p5 = scmp.lt.u32.totalorder %s849_s21, %s844_s14 }
  0x57   : > { %p847_p1 = pnand %p845_p3, %p1332_p7  ;;  %p853_p0 = scmp.lt.u32.totalorder %s844_s14, %s1149_s27 }
  0x58   : > { %p852_p11 = por %p851_p5, %p850_p8 }
  0x59   : > { %p848_p6 = pneg %p847_p1 }
  0x5a   : > { %p854_p13 = por %p853_p0, %p852_p11 }
  0x5c   : > { %p855_p2 = pnand %p854_p13, %p848_p6 }
  0x5e   : > { %858 = shalt.err (!%p855_p2)
}
  0x5f   : > { %s859_s12 = scalar_lea.vmem %s1151_s25, 64  ;;  %s984_s20 = smov [#allocation7]  }
  0x60   : > { %p860_p10 = scmp.ne.s32.totalorder %s1151_s25, %s859_s12  ;;  %s864_s17 = sshll.u32 %s984_s20, 4  ;;  %s865_s17 = int_to_ptr.vmem [resolvable:$false] %s864_s17 }
  0x61   : > { %s866_s1 = scalar_lea.vmem %s865_s17, 128  ;;  %p867_p12 = scmp.lt.s32.totalorder %s1151_s25, %s865_s17 }
  0x62   : > { %p862_p4 = pnand %p860_p10, %p1332_p7  ;;  %p868_p3 = scmp.lt.s32.totalorder %s866_s1, %s859_s12 }
  0x64   : > { %p863_p9 = pneg %p862_p4  ;;  %p869_p1 = por %p868_p3, %p867_p12 }
  0x66   : > { %p870_p8 = pnand %p869_p1, %p863_p9 }
  0x68   : > { %873 = shalt.err (!%p870_p8)
}
  0x69   : > { %p1333_p6 = scmp.ne.s32.totalorder %s1324_s6, 0  ;;  %s1334_s22 = sshll.u32 %s978_s18, 7 }
  0x6a   : > { %s1201_s30 = scalar_lea.hbm %s1306_s3, %s1334_s22  ;;  %s1335_s11 = sshll.u32 %s1054_s24, 3 }
  0x6b   : > { %728 = dma.hbm_to_vmem [thread:$0]  (!%p1333_p6), %s1149_s27, 64, %s1151_s25, %s1073_s7  }
  0x6c   : > { %s220_s21 = scalar_lea.vmem [#allocation8], %s1335_s11  ;;  %s217_s13 = scalar_lea.sflag [#allocation9], %s1054_s24 }
  0x6d   : > { %s227_s23 = sshll.u32 %s220_s21, 4  ;;  %s874_s12 = scalar_lea.hbm %s1201_s30, 128  ;;  %s228_s23 = int_to_ptr.vmem [resolvable:$true] %s227_s23 }
  0x6e   : > { %p875_p5 = scmp.ne.s32.totalorder %s1201_s30, %s874_s12  ;;  %s879_s27 = scalar_lea.hbm %s1306_s3, 256 }
  0x6f   : > { %p880_p13 = scmp.lt.u32.totalorder %s1201_s30, %s1306_s3  ;;  %p881_p2 = scmp.lt.u32.totalorder %s879_s27, %s874_s12 }
  0x70   : > { %p877_p11 = pnand %p875_p5, %p1332_p7  ;;  %p883_p4 = scmp.lt.u32.totalorder %s874_s12, %s1201_s30 }
  0x71   : > { %p882_p10 = por %p881_p2, %p880_p13 }
  0x72   : > { %p878_p0 = pneg %p877_p11 }
  0x73   : > { %p884_p9 = por %p883_p4, %p882_p10 }
  0x75   : > { %p885_p12 = pnand %p884_p9, %p878_p0 }
  0x77   : > { %888 = shalt.err (!%p885_p12)
}
  0x78   : > { %s889_s24 = scalar_lea.vmem %s228_s23, 128  ;;  %s985_s1 = smov [#allocation8]  }
  0x79   : > { %p890_p3 = scmp.ne.s32.totalorder %s228_s23, %s889_s24  ;;  %s894_s22 = sshll.u32 %s985_s1, 4  ;;  %s895_s22 = int_to_ptr.vmem [resolvable:$false] %s894_s22 }
  0x7a   : > { %s896_s26 = scalar_lea.vmem %s895_s22, 256  ;;  %p897_p5 = scmp.lt.s32.totalorder %s228_s23, %s895_s22 }
  0x7b   : > { %p892_p1 = pnand %p890_p3, %p1332_p7  ;;  %p898_p11 = scmp.lt.s32.totalorder %s896_s26, %s889_s24 }
  0x7d   : > { %p893_p8 = pneg %p892_p1  ;;  %p899_p6 = por %p898_p11, %p897_p5 }
  0x7f   : > { %p900_p2 = pnand %p899_p6, %p893_p8 }
  0x81   : > { %903 = shalt.err (!%p900_p2)
}
  0x82   : > { %p1336_p13 = scmp.ne.s32.totalorder %s1324_s6, 0  ;;  %p1337_p0 = scmp.ne.s32.totalorder %s1330_s10, 0 }
  0x83   : > { %p1338_p10 = scmp.eq.s32.totalorder (!%p1337_p0), %s1104_s28, 0 }
  0x84   : > { %731 = dma.hbm_to_vmem [thread:$0]  (!%p1336_p13), %s1201_s30, 128, %s228_s23, %s217_s13  }
  0x85   : > { %236 = sbr.rel (%p1337_p0) target bundleno = 413 (0x19d), region = 36 }
  0x8c   : > { %949 = dma.done.wait (%p1338_p10), [#allocation3], 256   ;;  %p1339_p7 = pmov %p1338_p10 }
  0x8d   : > { %s242_s9 = sand.u32 1, %s1104_s28   ;;  %s1231_s14 = sand.u32 1, %s970_s16  }
  0x8e   : > { %951 = vsyncadd (%p1339_p7), [#allocation3], 4294967040  ;;  %s1234_s11 = sshll.u32 %s1231_s14, 3  ;;  %s243_s6 = scalar_lea.sflag [#allocation6], %s242_s9 }
  0x8f   : > { %s246_s30 = scalar_lea.vmem [#allocation5], %s1234_s11  ;;  %p1340_p6 = scmp.ne.s32.totalorder %s1326_s8, 0 }
  0x91   : > { %953 = dma.done.wait (%p1340_p6), %s243_s6, 192  }
  0x92   : > { %955 = vsyncadd (%p1340_p6), %s243_s6, 4294967104  ;;  %s656_s10 = sshll.u32 %s1231_s14, 2  ;;  %s261_s23 = scalar_lea.sflag [#allocation9], %s1231_s14 }
  0x93   : > { %s255_s21 = scalar_lea.vmem [#allocation7], %s656_s10  ;;  %s264_s13 = scalar_lea.vmem [#allocation8], %s1234_s11 }
  0x94   : > { %957 = dma.done.wait (%p1340_p6), %s261_s23, 128  }
  0x95   : > { %959 = vsyncadd (%p1340_p6), %s261_s23, 4294967168  ;;  %v986_v0 = vmov 0.0   ;;  %vm987_vm0 = vmmov 0   ;;  %v778_v1 = vld [vmem:[#allocation2] sm:$0xff]   ;;  %v779_v2 = vld [vmem:[#allocation2 + $0x8] sm:$0xff]   ;;  %vm318_vm1 = vcmask 261120   ;;  %v453_v16 = vlaneseq }
  0x96   : > { %678 = vmatprep.subr.bf16.mxu0 %v986_v0  ;;  %686 = vmatprep.subr.bf16.mxu1 %v986_v0  ;;  %v362_v3 = vld [vmem:[%s264_s13] sm:$0xff]  ;;  %v305_v6 = vld [vmem:[%s255_s21] sm:$0xf]  ;;  %v300_v9 = vld [vmem:[%s246_s30] sm:$0xff]  ;;  %v988_v30 = vmov 0.025  }
  0x97   : > { %682 = vmatprep.mubr.msk.bf16.mxu0 %vm987_vm0, %v986_v0  ;;  %690 = vmatprep.mubr.msk.bf16.mxu1 %vm987_vm0, %v986_v0  ;;  %v363_v4 = vpack.c.bf16 %v362_v3, %v362_v3  ;;  %v470_v10 = vmax.f32 %v300_v9, 0.0  ;;  %v454_v18 = vand.u32 127, %v453_v16  ;;  %s664_s8 = sshll.u32 %s1104_s28, 3  ;;  %v495_v42 = vshrl.u32 %v453_v16, 7  ;;  %s666_s12 = sshll.u32 %s1104_s28, 7 }
  0x98   : > { %679 = vmatpush3.bf16.msra.mxu0 %v778_v1  ;;  %687 = vmatpush3.bf16.msra.mxu1 %v778_v1  ;;  %v496_v44 = vstv %s664_s8  ;;  %s298_s25 = scalar_lea.vmem [#allocation10], %s1234_s11  ;;  %s1259_s17 = scalar_lea.hbm %s1307_s4, %s666_s12 }
  0x99   : > { %680 = vmatprep.subr.bf16.mxu0 %v986_v0  ;;  %688 = vmatprep.subr.bf16.mxu1 %v986_v0  ;;  %v364_v5 = vunpack.c.l.bf16 %v363_v4  ;;  %v471_v11 = vmul.f32 2.0, %v470_v10  ;;  %v459_v22 = vand.u32 3, %v454_v18  ;;  %v497_v45 = vadd.s32 %v496_v44, %v495_v42  ;;  %s518_s7 = sshll.u32 %s298_s25, 4  ;;  %s505_s24 = scalar_lea.sflag [#allocation4], %s1231_s14  ;;  %s1261_s7 = int_to_ptr.vmem [resolvable:$true] %s518_s7 }
  0x9a   : > { %s904_s1 = scalar_lea.vmem %s1261_s7, 128  ;;  %p1341_p9 = scmp.ne.s32.totalorder %s1328_s29, 0 }
  0x9b   : > { %v365_v7 = vsub.f32 %v362_v3, %v364_v5  ;;  %v472_v12 = vsub.f32 %v300_v9, %v471_v11  ;;  %v467_v25 = vcvt.s32.f32 %v459_v22  ;;  %vm498_vm4 = vcmp.lt.s32.totalorder %v497_v45, 10  ;;  %p905_p4 = scmp.ne.s32.totalorder %s1261_s7, %s904_s1  ;;  %s989_s28 = smov [#allocation10]  }
  0x9c   : > { %681 = vmatpush3.bf16.msra.mxu0 %v779_v2  ;;  %689 = vmatpush3.bf16.msra.mxu1 %v779_v2  ;;  %s908_s22 = sshll.u32 %s989_s28, 4  ;;  %s909_s22 = int_to_ptr.vmem [resolvable:$false] %s908_s22 }
  0x9d   : > { %694 = vmatprep.subr.bf16.mxu1 %v986_v0  ;;  %v366_v8 = vpack.c.bf16 %v365_v7, %v365_v7  ;;  %v473_v13 = vmul.f32 1.442695, %v472_v12  ;;  %p906_p12 = pnand %p905_p4, %p1341_p9  ;;  %s910_s26 = scalar_lea.vmem %s909_s22, 256 }
  0x9e   : > { %p911_p1 = scmp.lt.s32.totalorder %s1261_s7, %s909_s22  ;;  %p912_p8 = scmp.lt.s32.totalorder %s910_s26, %s904_s1 }
  0x9f   : > { %683 = vmatmul.mubr.msk.bf16.vlgmr.msra.gmra.mrb[0].mxu0 %vm318_vm1, %v305_v6  ;;  %691 = vmatmul.mubr.msk.bf16.vlgmr.msra.gmra.mrb[0].mxu1 %vm318_vm1, %v366_v8  ;;  %780 = vpow2.f32 %v473_v13  ;;  %p907_p3 = pneg %p906_p12 }
  0xa0   : > { %695 = vmatpush3.bf16.msra.mxu1 %v778_v1  ;;  %698 = vmatprep.mubr.msk.bf16.mxu1 %vm987_vm0, %v986_v0  ;;  %p913_p5 = por %p912_p8, %p911_p1 }
  0xa1   : > { %696 = vmatprep.subr.bf16.mxu1 %v986_v0 }
  0xa2   : > { %p914_p11 = pnand %p913_p5, %p907_p3 }
  0xa4   : > { %697 = vmatpush3.bf16.msra.mxu1 %v779_v2 }
  0xa9   : > { %v781_v14 = vpop.eup %780 }
  0xaa   : > { %v475_v15 = vadd.f32 1.0, %v781_v14  ;;  %v478_v17 = vmul.f32 -0.5, %v781_v14  ;;  %v481_v21 = vand.u32 2147483647, %v781_v14 }
  0xab   : > { %699 = vmatmul.mubr.msk.bf16.vlgmr.msra.gmra.mrb[0].mxu1 %vm318_vm1, %v363_v4 }
  0xac   : > { %782 = vlog2.f32 %v475_v15  ;;  %v479_v19 = vadd.f32 1.0, %v478_v17  ;;  %vm482_vm2 = vcmp.lt.f32.partialorder %v481_v21, 0.0004427343 }
  0xae   : > { %v480_v24 = vmul.f32 %v781_v14, %v479_v19 }
  0xb6   : > { %v783_v20 = vpop.eup %782 }
  0xb7   : > { %v477_v23 = vmul.f32 0.6931472, %v783_v20 }
  0xb9   : > { %v483_v26 = vsel %vm482_vm2, %v480_v24, %v477_v23 }
  0xba   : > { %v484_v28 = vadd.f32 %v483_v26, %v470_v10 }
 0x172   : > { %v356_v27 = vpop.f32.mrb[0].mxu0 }
 0x173   : > { %vm468_vm3 = vcmp.eq.f32.partialorder %v356_v27, %v467_v25  ;;  %v684_v29 = vpop.f32.mrb[1].mxu0 }
 0x174   : > { %v469_v31 = vsel %vm468_vm3, 0.925, %v988_v30  ;;  %v359_v32 = vpop.f32.mrb[2].mxu0 }
 0x175   : > { %v485_v33 = vmul.f32 %v469_v31, %v300_v9  ;;  %v685_v34 = vpop.f32.mrb[3].mxu0 }
 0x177   : > { %v487_v35 = vadd.f32 %v485_v33, %v484_v28  ;;  %v486_v46 = vsub.f32 %v484_v28, %v485_v33 }
 0x179   : > { %v488_v36 = vsub.f32 %v487_v35, %v300_v9 }
 0x17b   : > { %v489_v37 = vmul.f32 -2.0, %v488_v36 }
 0x17d   : > { %v490_v38 = vmul.f32 1.442695, %v489_v37 }
 0x17e   : > { %v447_v39 = vpop.f32.mrb[0].mxu1 }
 0x17f   : > { %784 = vpow2.f32 %v490_v38  ;;  %v700_v40 = vpop.f32.mrb[1].mxu1 }
 0x180   : > { %v450_v41 = vpop.f32.mrb[2].mxu1 }
 0x181   : > { %v701_v43 = vpop.f32.mrb[3].mxu1 }
 0x189   : > { %v785_v47 = vpop.eup %784 }
 0x18a   : > { %v492_v48 = vmul.f32 %v785_v47, %v486_v46 }
 0x18c   : > { %v499_v49 = vmul.f32 %v492_v48, %v447_v39 }
 0x18e   : > { %v502_v50 = vsel %vm498_vm4, %v499_v49, 0.0 }
 0x18f   : > { %503 = vst [vmem:[%s298_s25] sm:$0xff] %v502_v50 }
 0x190   : > { %917 = shalt.err (!%p914_p11)
}
 0x191   : > { %s918_s9 = scalar_lea.hbm %s1259_s17, 128  ;;  %s922_s6 = scalar_lea.hbm %s1307_s4, 256 }
 0x192   : > { %p919_p2 = scmp.ne.s32.totalorder %s1259_s17, %s918_s9  ;;  %p923_p10 = scmp.lt.u32.totalorder %s1259_s17, %s1307_s4 }
 0x193   : > { %p924_p7 = scmp.lt.u32.totalorder %s922_s6, %s918_s9  ;;  %p926_p4 = scmp.lt.u32.totalorder %s918_s9, %s1259_s17 }
 0x194   : > { %p920_p13 = pnand %p919_p2, %p1341_p9 }
 0x195   : > { %p925_p6 = por %p924_p7, %p923_p10 }
 0x196   : > { %p921_p0 = pneg %p920_p13 }
 0x197   : > { %p927_p12 = por %p926_p4, %p925_p6 }
 0x199   : > { %p928_p3 = pnand %p927_p12, %p921_p0 }
 0x19b   : > { %931 = shalt.err (!%p928_p3)
}
 0x19c   : > { %716 = dma.vmem_to_hbm [thread:$0]  (%p1341_p9), %s1261_s7, 128, %s1259_s17, %s505_s24  }
 0x19d PF: > { %s530_s21 = sand.u32 1, %s966_s15   ;;  %p1342_p1 = scmp.ne.s32.totalorder %s1329_s5, 0 }
 0x19e   : > { %p1343_p8 = scmp.ge.s32.totalorder %s978_s18, 2  ;;  %s531_s23 = scalar_lea.sflag [#allocation4], %s530_s21 }
 0x1a0   : > { %p733_p5 = pnand %p1343_p8, %p1342_p1 }
 0x1a2   : > { %961 = dma.done.wait (!%p733_p5), %s531_s23, 128  }
 0x1a3   : > { %963 = vsyncadd (!%p733_p5), %s531_s23, 4294967168  ;;  %s1344_s13 = sld [smem:[#allocation15_spill]]  ;;  %s1345_s17 = sld [smem:[#allocation16_spill]] }
 0x1a4   : > { %p21_p11 = scmp.ge.s32.totalorder %s1036_s19, 4   ;;  %s1346_s15 = smov %s970_s16 }
 0x1a5   : > { %s1348_s18 = smov %s1036_s19 }
 0x1a6   :  { %23 = sbr.rel (!%p21_p11) target bundleno = 10 (0xa), region = 110 }
 0x1a9   : > { %s1347_s16 = smov %s1344_s13 }
 0x1ad   :  { %536 = vsyncpa [#allocation3], 1 }
 0x1ae   :  { %538 = vsyncpa [#allocation3 + $0x1], 1 }
 0x1af   :  { %539 = vsyncpa [#allocation6], 1 }
 0x1b0   :  { %541 = vsyncpa [#allocation6 + $0x1], 1 }
 0x1b1   :  { %542 = vsyncpa [#allocation9], 1 }
 0x1b2   :  { %544 = vsyncpa [#allocation9 + $0x1], 1 }
 0x1b3   :  { %545 = vsyncpa [#allocation4], 1 }
 0x1b4   :  { %547 = vsyncpa [#allocation4 + $0x1], 1 }

</bundles_post_ra>
